<compile_context>
chip_gen: v7x
topology: tpu7x:2x2x1
jax: 0.10.0
libtpu: 0.0.40
codegen_flags: <defaults>
</compile_context>

<pallas_src>
import jax
import jax.numpy as jnp
from jax.experimental import pallas as pl
from jax.experimental.pallas import tpu as pltpu

HIDDEN1 = 128   # fc1 out features
HIDDEN2 = 64    # fc2 out features


def _qnetwork_kernel(x_ref, w1_ref, b1_ref, w2_ref, b2_ref, w3_ref, b3_ref, o_ref):
    """Fused 3-layer MLP: relu(x@W1+b1) -> relu(@W2+b2) -> @W3+b3."""
    # x arrives f32; cast to the bf16 MXU operand dtype in-kernel (free on VPU).
    x = x_ref[...].astype(w1_ref.dtype)

    # Layer 1: bf16 operands into the MXU, f32 accumulate, f32 bias + ReLU.
    h1 = jnp.dot(x, w1_ref[...], preferred_element_type=jnp.float32) + b1_ref[...]
    h1 = jnp.maximum(h1, 0.0)

    # Layer 2: true N=64 output (no lane padding, no extra MXU work).
    h2 = jnp.dot(h1.astype(w2_ref.dtype), w2_ref[...],
                 preferred_element_type=jnp.float32) + b2_ref[...]
    h2 = jnp.maximum(h2, 0.0)

    # Layer 3: K=64, N=action_size; store only the real action lanes.
    out = jnp.dot(h2.astype(w3_ref.dtype), w3_ref[...],
                  preferred_element_type=jnp.float32) + b3_ref[...]
    o_ref[...] = out.astype(o_ref.dtype)


def qnetwork_forward(x, params, *, block_b=2048):
    """x: (B, state_size) float32. params: dict of w1,b1,w2,b2,w3,b3."""
    w1, b1 = params["w1"], params["b1"]
    w2, b2 = params["w2"], params["b2"]
    w3, b3 = params["w3"], params["b3"]

    B, S = x.shape
    A = w3.shape[1]

    # ---- balanced batch tiling (multiple of 8 sublanes for f32) ----
    n_tiles = pl.cdiv(B, block_b)
    if n_tiles == 1 and B >= 1024:
        n_tiles = 2                      # keep both v7x TensorCores busy
    tb = pl.cdiv(pl.cdiv(B, n_tiles), 8) * 8
    b_pad = n_tiles * tb
    if b_pad != B:
        x = jnp.pad(x, ((0, b_pad - B), (0, 0)))

    # Weights/biases are small: constant block index keeps them VMEM-resident.
    resident = lambda a: pl.BlockSpec(a.shape, lambda i: (0, 0))

    flops = 2 * b_pad * (S * HIDDEN1 + HIDDEN1 * HIDDEN2 + HIDDEN2 * A)
    bytes_accessed = (
        x.size * x.dtype.itemsize
        + sum(a.size * a.dtype.itemsize for a in (w1, b1, w2, b2, w3, b3))
        + b_pad * A * 4
    )

    out = pl.pallas_call(
        _qnetwork_kernel,
        out_shape=jax.ShapeDtypeStruct((b_pad, A), jnp.float32),
        grid_spec=pltpu.PrefetchScalarGridSpec(
            num_scalar_prefetch=0,
            grid=(n_tiles,),
            in_specs=[
                pl.BlockSpec((tb, S), lambda i: (i, 0)),   # streamed x tile
                resident(w1), resident(b1),
                resident(w2), resident(b2),
                resident(w3), resident(b3),
            ],
            # Last dim A equals the full array dim -> legal block; only the
            # real action lanes are written back to HBM (contiguous rows).
            out_specs=pl.BlockSpec((tb, A), lambda i: (i, 0)),
        ),
        compiler_params=pltpu.CompilerParams(
            dimension_semantics=("parallel",)),            # megacore on v7x
        cost_estimate=pl.CostEstimate(
            flops=flops, transcendentals=0, bytes_accessed=bytes_accessed),
    )(x, w1, b1, w2, b2, w3, b3)

    return out[:B] if b_pad != B else out


def init_qnetwork_params(key, state_size, action_size, *, weight_dtype=jnp.bfloat16):
    """nn.Linear-style init (U[-1/sqrt(fan_in), +1/sqrt(fan_in)]).

    Weights stored in bf16 for the MXU (exact bf16->f32 accumulation in-kernel);
    biases kept in f32 for the f32 epilogue.  This intentionally trades a small
    amount of precision vs. a pure-f32 PyTorch QNetwork.
    """
    def linear(k, fan_in, fan_out):
        kw, kb = jax.random.split(k)
        bound = 1.0 / jnp.sqrt(jnp.float32(fan_in))
        w = jax.random.uniform(kw, (fan_in, fan_out), jnp.float32, -bound, bound)
        b = jax.random.uniform(kb, (1, fan_out), jnp.float32, -bound, bound)
        return w.astype(weight_dtype), b

    k1, k2, k3 = jax.random.split(key, 3)
    w1, b1 = linear(k1, state_size, HIDDEN1)
    w2, b2 = linear(k2, HIDDEN1, HIDDEN2)
    w3, b3 = linear(k3, HIDDEN2, action_size)
    return {"w1": w1, "b1": b1, "w2": w2, "b2": b2, "w3": w3, "b3": b3}


def qnetwork_reference(x, p):
    """Pure-JAX reference with the same numerics (bf16 operands, f32 accum)."""
    def dense(h, w, b):
        return jnp.dot(h.astype(w.dtype), w, preferred_element_type=jnp.float32) + b
    h1 = jnp.maximum(dense(x, p["w1"], p["b1"]), 0.0)
    h2 = jnp.maximum(dense(h1, p["w2"], p["b2"]), 0.0)
    return dense(h2, p["w3"], p["b3"])


if __name__ == "__main__":
    key = jax.random.PRNGKey(0)
    state_size, action_size, batch = 8, 4, 2

    pk, xk = jax.random.split(key)
    params = init_qnetwork_params(pk, state_size, action_size)
    x = jax.random.normal(xk, (batch, state_size), jnp.float32)

    out = qnetwork_forward(x, params)
    out = jax.block_until_ready(out)

    ref = qnetwork_reference(x, params)
    assert out.shape == (batch, action_size)
    assert jnp.allclose(out, ref, atol=1e-3, rtol=1e-3), "mismatch vs reference"

    print("KERNEL_OK")
</pallas_src>

<mosaic_0001>
module attributes {stable_mosaic.version = 11 : i64} {
  func.func @_qnetwork_kernel(%arg0: i32, %arg1: memref<8x8xf32, #tpu.memory_space<vmem>>, %arg2: memref<8x128xbf16, #tpu.memory_space<vmem>>, %arg3: memref<1x128xf32, #tpu.memory_space<vmem>>, %arg4: memref<128x64xbf16, #tpu.memory_space<vmem>>, %arg5: memref<1x64xf32, #tpu.memory_space<vmem>>, %arg6: memref<64x4xbf16, #tpu.memory_space<vmem>>, %arg7: memref<1x4xf32, #tpu.memory_space<vmem>>, %arg8: memref<8x4xf32, #tpu.memory_space<vmem>>) attributes {dimension_semantics = [#tpu.dimension_semantics<parallel>], iteration_bounds = array<i64: 1>, scalar_prefetch = 0 : i64, scratch_operands = 0 : i64, tpu.core_type = #tpu.core_type<tc>, window_params = [{transform_indices = @transform_0, window_bounds = array<i64: 8, 8>}, {pipeline_mode = #tpu.pipeline_mode<synchronous>, transform_indices = @transform_1, window_bounds = array<i64: 8, 128>}, {pipeline_mode = #tpu.pipeline_mode<synchronous>, transform_indices = @transform_2, window_bounds = array<i64: 1, 128>}, {pipeline_mode = #tpu.pipeline_mode<synchronous>, transform_indices = @transform_3, window_bounds = array<i64: 128, 64>}, {pipeline_mode = #tpu.pipeline_mode<synchronous>, transform_indices = @transform_4, window_bounds = array<i64: 1, 64>}, {pipeline_mode = #tpu.pipeline_mode<synchronous>, transform_indices = @transform_5, window_bounds = array<i64: 64, 4>}, {pipeline_mode = #tpu.pipeline_mode<synchronous>, transform_indices = @transform_6, window_bounds = array<i64: 1, 4>}, {transform_indices = @transform_7, window_bounds = array<i64: 8, 4>}]} {
    %c0 = arith.constant 0 : index
    %c0_0 = arith.constant 0 : index
    %0 = vector.load %arg1[%c0, %c0_0] : memref<8x8xf32, #tpu.memory_space<vmem>>, vector<8x8xf32>
    %1 = arith.truncf %0 : vector<8x8xf32> to vector<8x8xbf16>
    %c0_1 = arith.constant 0 : index
    %c0_2 = arith.constant 0 : index
    %2 = vector.load %arg2[%c0_1, %c0_2] : memref<8x128xbf16, #tpu.memory_space<vmem>>, vector<8x128xbf16>
    %cst = arith.constant dense<0.000000e+00> : vector<8x128xf32>
    %3 = tpu.matmul %1, %2, %cst {dimension_numbers = #tpu.dot_dimension_numbers<[1], [0], [0], [1], [0, 0, 1, 1], [], []>} : vector<8x8xbf16>, vector<8x128xbf16>, vector<8x128xf32> -> vector<8x128xf32>
    %c0_3 = arith.constant 0 : index
    %c0_4 = arith.constant 0 : index
    %4 = vector.load %arg3[%c0_3, %c0_4] : memref<1x128xf32, #tpu.memory_space<vmem>>, vector<1x128xf32>
    %5 = vector.broadcast %4 : vector<1x128xf32> to vector<8x128xf32>
    %6 = arith.addf %3, %5 : vector<8x128xf32>
    %cst_5 = arith.constant 0.000000e+00 : f32
    %7 = vector.broadcast %cst_5 : f32 to vector<8x128xf32>
    %8 = arith.maximumf %6, %7 : vector<8x128xf32>
    %9 = arith.truncf %8 : vector<8x128xf32> to vector<8x128xbf16>
    %c0_6 = arith.constant 0 : index
    %c0_7 = arith.constant 0 : index
    %10 = vector.load %arg4[%c0_6, %c0_7] : memref<128x64xbf16, #tpu.memory_space<vmem>>, vector<128x64xbf16>
    %cst_8 = arith.constant dense<0.000000e+00> : vector<8x64xf32>
    %11 = tpu.matmul %9, %10, %cst_8 {dimension_numbers = #tpu.dot_dimension_numbers<[1], [0], [0], [1], [0, 0, 1, 1], [], []>} : vector<8x128xbf16>, vector<128x64xbf16>, vector<8x64xf32> -> vector<8x64xf32>
    %c0_9 = arith.constant 0 : index
    %c0_10 = arith.constant 0 : index
    %12 = vector.load %arg5[%c0_9, %c0_10] : memref<1x64xf32, #tpu.memory_space<vmem>>, vector<1x64xf32>
    %13 = vector.broadcast %12 : vector<1x64xf32> to vector<8x64xf32>
    %14 = arith.addf %11, %13 : vector<8x64xf32>
    %cst_11 = arith.constant 0.000000e+00 : f32
    %15 = vector.broadcast %cst_11 : f32 to vector<8x64xf32>
    %16 = arith.maximumf %14, %15 : vector<8x64xf32>
    %17 = arith.truncf %16 : vector<8x64xf32> to vector<8x64xbf16>
    %c0_12 = arith.constant 0 : index
    %c0_13 = arith.constant 0 : index
    %18 = vector.load %arg6[%c0_12, %c0_13] : memref<64x4xbf16, #tpu.memory_space<vmem>>, vector<64x4xbf16>
    %cst_14 = arith.constant dense<0.000000e+00> : vector<8x4xf32>
    %19 = tpu.matmul %17, %18, %cst_14 {dimension_numbers = #tpu.dot_dimension_numbers<[1], [0], [0], [1], [0, 0, 1, 1], [], []>} : vector<8x64xbf16>, vector<64x4xbf16>, vector<8x4xf32> -> vector<8x4xf32>
    %c0_15 = arith.constant 0 : index
    %c0_16 = arith.constant 0 : index
    %20 = vector.load %arg7[%c0_15, %c0_16] : memref<1x4xf32, #tpu.memory_space<vmem>>, vector<1x4xf32>
    %21 = vector.broadcast %20 : vector<1x4xf32> to vector<8x4xf32>
    %22 = arith.addf %19, %21 : vector<8x4xf32>
    %c0_17 = arith.constant 0 : index
    %c0_18 = arith.constant 0 : index
    %23 = vector.load %arg8[%c0_17, %c0_18] : memref<8x4xf32, #tpu.memory_space<vmem>>, vector<8x4xf32>
    tpu.vector_store %arg8[%c0_17, %c0_18], %22 {strides = array<i32>} : memref<8x4xf32, #tpu.memory_space<vmem>>, vector<8x4xf32>,
    return
  }
  func.func @transform_0(%arg0: i32) -> (i32, i32) {
    %c0_i32 = arith.constant 0 : i32
    %c0_i32_0 = arith.constant 0 : i32
    return %arg0, %c0_i32 : i32, i32
  }
  func.func @transform_1(%arg0: i32) -> (i32, i32) {
    %c0_i32 = arith.constant 0 : i32
    %c0_i32_0 = arith.constant 0 : i32
    %c0_i32_1 = arith.constant 0 : i32
    return %c0_i32, %c0_i32_0 : i32, i32
  }
  func.func @transform_2(%arg0: i32) -> (i32, i32) {
    %c0_i32 = arith.constant 0 : i32
    %c0_i32_0 = arith.constant 0 : i32
    %c0_i32_1 = arith.constant 0 : i32
    return %c0_i32, %c0_i32_0 : i32, i32
  }
  func.func @transform_3(%arg0: i32) -> (i32, i32) {
    %c0_i32 = arith.constant 0 : i32
    %c0_i32_0 = arith.constant 0 : i32
    %c0_i32_1 = arith.constant 0 : i32
    return %c0_i32, %c0_i32_0 : i32, i32
  }
  func.func @transform_4(%arg0: i32) -> (i32, i32) {
    %c0_i32 = arith.constant 0 : i32
    %c0_i32_0 = arith.constant 0 : i32
    %c0_i32_1 = arith.constant 0 : i32
    return %c0_i32, %c0_i32_0 : i32, i32
  }
  func.func @transform_5(%arg0: i32) -> (i32, i32) {
    %c0_i32 = arith.constant 0 : i32
    %c0_i32_0 = arith.constant 0 : i32
    %c0_i32_1 = arith.constant 0 : i32
    return %c0_i32, %c0_i32_0 : i32, i32
  }
  func.func @transform_6(%arg0: i32) -> (i32, i32) {
    %c0_i32 = arith.constant 0 : i32
    %c0_i32_0 = arith.constant 0 : i32
    %c0_i32_1 = arith.constant 0 : i32
    return %c0_i32, %c0_i32_0 : i32, i32
  }
  func.func @transform_7(%arg0: i32) -> (i32, i32) {
    %c0_i32 = arith.constant 0 : i32
    %c0_i32_0 = arith.constant 0 : i32
    return %arg0, %c0_i32 : i32, i32
  }
}

</mosaic_0001>

<bundles_post_ra>
// kernel: tpu_custom_call.1
= control target key start
LH: loop header
LB: loop body
LE: loop exit
PB: predicated region body
PF: predicated region fallthrough
CT: control target
= control target key end

     0   :  { %vm41_vm0 = vcmask 1043456   ;;  %v374_v0 = vmov 0.0   ;;  %vm375_vm1 = vmmov 0   ;;  %vm37_vm2 = vcmask 64512   ;;  %s473_s1 = inlined_call_operand.vmem [shape: bf16[8,128], index: 1, kind: input, shape index: {}]   ;;  %s474_s0 = inlined_call_operand.vmem [shape: f32[8,8], index: 0, kind: input, shape index: {}]   ;;  %s475_s3 = inlined_call_operand.vmem [shape: bf16[128,64], index: 3, kind: input, shape index: {}]   ;;  %s476_s5 = inlined_call_operand.vmem [shape: bf16[64,4], index: 5, kind: input, shape index: {}]   ;;  %s477_s2 = inlined_call_operand.vmem [shape: f32[1,128], index: 2, kind: input, shape index: {}]   ;;  %s478_s4 = inlined_call_operand.vmem [shape: f32[1,64], index: 4, kind: input, shape index: {}]   ;;  %s479_s6 = inlined_call_operand.vmem [shape: f32[1,4], index: 6, kind: input, shape index: {}]   ;;  %s480_s7 = inlined_call_operand.vmem [shape: f32[8,4], index: 7, kind: output, shape index: {}]  }
   0x1   :  { %322 = vmatprep.subr.bf16.mxu0 %v374_v0  ;;  %v29_v1 = vld [vmem:[%s473_s1] sm:$0xf]  ;;  %324 = vmatprep.mubr.msk.bf16.mxu0 %vm375_vm1, %v374_v0  ;;  %v363_v6 = vld [vmem:[%s475_s3 + $0x8] sm:$0xff]   ;;  %v364_v7 = vld [vmem:[%s475_s3 + $0x10] sm:$0xff]   ;;  %vm239_vm3 = vcmask 523264   ;;  %vm283_vm4 = vcmask 31744  }
   0x2   :  { %v27_v2 = vld [vmem:[%s474_s0] sm:$0xff]  ;;  %v43_v3 = vsel %vm41_vm0, %v29_v1, 0  ;;  %328 = vmatprep.subr.bf16.mxu1 %v374_v0  ;;  %344 = vmatprep.mubr.msk.bf16.mxu1 %vm375_vm1, %v374_v0  ;;  %v365_v8 = vld [vmem:[%s475_s3 + $0x18] sm:$0xff]   ;;  %v367_v10 = vld [vmem:[%s475_s3 + $0x28] sm:$0xff]  }
   0x3   :  { %v28_v4 = vpack.c.bf16 %v27_v2, %v27_v2  ;;  %v362_v5 = vld [vmem:[%s475_s3] sm:$0xff]   ;;  %323 = vmatpush3.bf16.msra.mxu0 %v43_v3  ;;  %v368_v11 = vld [vmem:[%s475_s3 + $0x30] sm:$0xff]   ;;  %v369_v12 = vld [vmem:[%s475_s3 + $0x38] sm:$0xff]  }
   0x4   :  { %329 = vmatpush3.bf16.msra.mxu1 %v362_v5  ;;  %348 = vmatprep.subr.bf16.mxu0 %v374_v0  ;;  %v366_v9 = vld [vmem:[%s475_s3 + $0x20] sm:$0xff]   ;;  %v371_v14 = vld [vmem:[%s476_s5 + $0x8] sm:$0xff]   ;;  %v372_v23 = vld [vmem:[%s476_s5 + $0x10] sm:$0xff]  }
   0x5   :  { %330 = vmatprep.subr.bf16.mxu1 %v374_v0  ;;  %v370_v13 = vld [vmem:[%s476_s5] sm:$0xff]   ;;  %v373_v24 = vld [vmem:[%s476_s5 + $0x18] sm:$0xff]  }
   0x6   :  { %325 = vmatmul.mubr.msk.bf16.vlgmr.msra.gmra.mrb[0].mxu0 %vm37_vm2, %v28_v4  ;;  %v289_v15 = vld [vmem:[%s477_s2] ss:$0 sm:$0xff] }
   0x7   :  { %356 = vmatprep.mubr.msk.bf16.mxu0 %vm375_vm1, %v374_v0  ;;  %349 = vmatpush3.bf16.msra.mxu0 %v370_v13  ;;  %v291_v25 = vld [vmem:[%s478_s4] ss:$0 sm:$0xff] }
   0x8   :  { %331 = vmatpush3.bf16.msra.mxu1 %v363_v6  ;;  %350 = vmatprep.subr.bf16.mxu0 %v374_v0  ;;  %v300_v33 = vld [vmem:[%s479_s6] ss:$0 sm:$0xff] }
   0x9   :  { %332 = vmatprep.subr.bf16.mxu1 %v374_v0 }
   0xb   :  { %351 = vmatpush3.bf16.msra.mxu0 %v371_v14 }
   0xc   :  { %333 = vmatpush3.bf16.msra.mxu1 %v364_v7  ;;  %352 = vmatprep.subr.bf16.mxu0 %v374_v0 }
   0xd   :  { %334 = vmatprep.subr.bf16.mxu1 %v374_v0 }
   0xf   :  { %353 = vmatpush3.bf16.msra.mxu0 %v372_v23 }
  0x10   :  { %335 = vmatpush3.bf16.msra.mxu1 %v365_v8  ;;  %354 = vmatprep.subr.bf16.mxu0 %v374_v0 }
  0x11   :  { %336 = vmatprep.subr.bf16.mxu1 %v374_v0 }
  0x13   :  { %355 = vmatpush3.bf16.msra.mxu0 %v373_v24 }
  0x14   :  { %337 = vmatpush3.bf16.msra.mxu1 %v366_v9 }
  0x15   :  { %338 = vmatprep.subr.bf16.mxu1 %v374_v0 }
  0x18   :  { %339 = vmatpush3.bf16.msra.mxu1 %v367_v10 }
  0x19   :  { %340 = vmatprep.subr.bf16.mxu1 %v374_v0 }
  0x1c   :  { %341 = vmatpush3.bf16.msra.mxu1 %v368_v11 }
  0x1d   :  { %342 = vmatprep.subr.bf16.mxu1 %v374_v0 }
  0x20   :  { %343 = vmatpush3.bf16.msra.mxu1 %v369_v12 }
  0xd9   :  { %v79_v16 = vpop.f32.mrb[0].mxu0 }
  0xda   :  { %v80_v17 = vadd.f32 %v289_v15, %v79_v16  ;;  %v326_v18 = vpop.f32.mrb[1].mxu0 }
  0xdb   :  { %v82_v19 = vpop.f32.mrb[2].mxu0 }
  0xdc   :  { %v85_v20 = vmax.f32 %v80_v17, 0.0  ;;  %v327_v21 = vpop.f32.mrb[3].mxu0 }
  0xde   :  { %v86_v22 = vpack.c.bf16 %v85_v20, %v85_v20 }
  0xe0   :  { %345 = vmatmul.mubr.bf16.vlgmr.msra.gmra.mrb[0].mxu1 %v86_v22 }
 0x1b3   :  { %v192_v26 = vpop.f32.mrb[0].mxu1 }
 0x1b4   :  { %v193_v27 = vadd.f32 %v291_v25, %v192_v26  ;;  %v346_v28 = vpop.f32.mrb[1].mxu1 }
 0x1b5   :  { %v195_v29 = vpop.f32.mrb[2].mxu1 }
 0x1b6   :  { %v198_v30 = vmax.f32 %v193_v27, 0.0  ;;  %v347_v31 = vpop.f32.mrb[3].mxu1 }
 0x1b8   :  { %v199_v32 = vpack.c.bf16 %v198_v30, %v198_v30 }
 0x1ba   :  { %357 = vmatmul.mubr.msk.bf16.vlgmr.msra.gmra.mrb[4].mxu0 %vm239_vm3, %v199_v32 }
 0x28d   :  { %v277_v34 = vpop.f32.mrb[4].mxu0 }
 0x28e   :  { %v278_v35 = vadd.f32 %v300_v33, %v277_v34  ;;  %v358_v36 = vpop.f32.mrb[5].mxu0 }
 0x28f   :  { %v280_v37 = vpop.f32.mrb[6].mxu0 }
 0x290   :  { %284 = vst.msk [vmem:[%s480_s7] sm:$0xff] %vm283_vm4, %v278_v35  ;;  %v359_v38 = vpop.f32.mrb[7].mxu0 }

</bundles_post_ra>
